<compile_context>
chip_gen: v7x
topology: tpu7x:2x2x1
jax: 0.10.0
libtpu: 0.0.40
codegen_flags: <defaults>
</compile_context>

<pallas_src>
import jax
import jax.numpy as jnp
from jax import lax
from jax.experimental import pallas as pl
from jax.experimental.pallas import tpu as pltpu


def _round_up(x, m):
    return (x + m - 1) // m * m


def _bbox_kernel(std_ref, mean_ref, boxes_ref, deltas_ref, out_ref):
    # boxes_ref / deltas_ref / out_ref : (tm, 128) f32 VMEM tiles, lanes hold
    #   the native interleaving: lane l -> coord c = l % 4 (x1, y1, x2, y2).
    # std_ref / mean_ref : (1, 128) lane-pattern rows ([s0,s1,s2,s3] * 32).
    b = boxes_ref[...]
    d = deltas_ref[...]

    # Lane-class mask: True on lanes holding x1/y1 (and dx/dy).
    lane = lax.broadcasted_iota(jnp.int32, b.shape, dimension=1)
    is_lo = (lane & 3) < 2

    # Lane rotations (XLU).  pltpu.roll matches np.roll: out[l] = in[(l-shift)%128].
    #   shift=2   -> each lane sees the value 2 lanes to its LEFT  (x1/y1 for x2/y2 lanes)
    #   shift=126 -> each lane sees the value 2 lanes to its RIGHT (x2/y2 for x1/y1 lanes)
    # 32 boxes fit exactly in a 128-lane row, so the wrapped lanes are never selected.
    b_left2 = pltpu.roll(b, shift=2, axis=1)
    b_right2 = pltpu.roll(b, shift=126, axis=1)
    lo = jnp.where(is_lo, b, b_left2)      # x1 on x-lanes, y1 on y-lanes
    hi = jnp.where(is_lo, b_right2, b)     # x2 on x-lanes, y2 on y-lanes

    size = hi - lo                         # width on x-lanes, height on y-lanes
    ctr = lo + 0.5 * size                  # ctr_x / ctr_y

    # Per-lane std/mean scaling (sublane broadcast of the (1,128) patterns).
    ds = d * std_ref[...] + mean_ref[...]  # dx, dy, dw, dh interleaved
    ds_left2 = pltpu.roll(ds, shift=2, axis=1)
    ds_right2 = pltpu.roll(ds, shift=126, axis=1)
    dpos = jnp.where(is_lo, ds, ds_left2)     # dx on x-lanes, dy on y-lanes
    dsz = jnp.where(is_lo, ds_right2, ds)     # dw on x-lanes, dh on y-lanes

    pred_ctr = ctr + dpos * size
    # NOTE: no clamp on dw/dh before exp -- matches the PyTorch module exactly.
    half = 0.5 * (jnp.exp(dsz) * size)        # 0.5*pred_w / 0.5*pred_h

    # Full-width unmasked store in the same interleaved layout:
    #   x1' y1' x2' y2' land directly where the consumer expects them.
    out_ref[...] = jnp.where(is_lo, pred_ctr - half, pred_ctr + half)


def _pick_tm(R, tm):
    """Pick the block row count.

    Default block is 2 MiB/operand (tm=4096 rows), but cap it so that inputs
    big enough to split still produce >= 4 grid steps (v7x megacore + DMA
    overlap), with a floor of 256 rows (128 KiB/operand) per step so the
    ~0.35us per-step overhead stays amortised.
    """
    tm = _round_up(max(tm, 8), 8)
    cap = max(256, _round_up(pl.cdiv(R, 4), 8))
    return max(8, min(tm, R, cap))


def bbox_transform(boxes, deltas, mean=None, std=None, tm=4096):
    """boxes, deltas: (B, N, 4) -> pred_boxes (B, N, 4) float32."""
    if mean is None:
        mean = jnp.array([0.0, 0.0, 0.0, 0.0], dtype=jnp.float32)
    if std is None:
        std = jnp.array([0.1, 0.1, 0.2, 0.2], dtype=jnp.float32)
    mean = jnp.asarray(mean, jnp.float32)
    std = jnp.asarray(std, jnp.float32)

    B, N, C = boxes.shape
    assert C == 4
    T4 = B * N * 4                               # total scalars per operand
    R = _round_up(pl.cdiv(T4, 128), 8)           # lane rows, (8,128) granule
    P = R * 128

    def to_flat(x):
        x = jnp.asarray(x, jnp.float32).reshape(-1)   # zero-copy for (B,N,4)
        if P != T4:
            x = jnp.pad(x, (0, P - T4))               # tiny tail pad only
        return x.reshape(R, 128)

    boxes_f = to_flat(boxes)
    deltas_f = to_flat(deltas)

    # Lane patterns for std/mean: [v0, v1, v2, v3] repeated 32x across lanes.
    std_row = jnp.tile(std, 32).reshape(1, 128)
    mean_row = jnp.tile(mean, 32).reshape(1, 128)

    tm_eff = _pick_tm(R, tm)
    grid = (pl.cdiv(R, tm_eff),)                 # ragged last block allowed

    out = pl.pallas_call(
        _bbox_kernel,
        out_shape=jax.ShapeDtypeStruct((R, 128), jnp.float32),
        grid=grid,
        in_specs=[
            pl.BlockSpec((1, 128), lambda i: (0, 0)),        # std pattern
            pl.BlockSpec((1, 128), lambda i: (0, 0)),        # mean pattern
            pl.BlockSpec((tm_eff, 128), lambda i: (i, 0)),   # boxes (interleaved)
            pl.BlockSpec((tm_eff, 128), lambda i: (i, 0)),   # deltas (interleaved)
        ],
        out_specs=pl.BlockSpec((tm_eff, 128), lambda i: (i, 0)),
        compiler_params=pltpu.CompilerParams(
            dimension_semantics=("parallel",),
            vmem_limit_bytes=32 * 1024 * 1024,
        ),
        cost_estimate=pl.CostEstimate(
            flops=18 * P,
            transcendentals=P,
            bytes_accessed=3 * P * 4,
        ),
    )(std_row, mean_row, boxes_f, deltas_f)

    out = out.reshape(-1)
    if P != T4:
        out = out[:T4]
    return out.reshape(B, N, 4)


def _reference(boxes, deltas, mean, std):
    widths = boxes[:, :, 2] - boxes[:, :, 0]
    heights = boxes[:, :, 3] - boxes[:, :, 1]
    ctr_x = boxes[:, :, 0] + 0.5 * widths
    ctr_y = boxes[:, :, 1] + 0.5 * heights
    dx = deltas[:, :, 0] * std[0] + mean[0]
    dy = deltas[:, :, 1] * std[1] + mean[1]
    dw = deltas[:, :, 2] * std[2] + mean[2]
    dh = deltas[:, :, 3] * std[3] + mean[3]
    pred_ctr_x = ctr_x + dx * widths
    pred_ctr_y = ctr_y + dy * heights
    pred_w = jnp.exp(dw) * widths
    pred_h = jnp.exp(dh) * heights
    return jnp.stack(
        [pred_ctr_x - 0.5 * pred_w, pred_ctr_y - 0.5 * pred_h,
         pred_ctr_x + 0.5 * pred_w, pred_ctr_y + 0.5 * pred_h], axis=2)


if __name__ == "__main__":
    key = jax.random.PRNGKey(0)
    k1, k2, k3, k4, k5, k6 = jax.random.split(key, 6)

    mean = jnp.array([0.0, 0.0, 0.0, 0.0], dtype=jnp.float32)
    std = jnp.array([0.1, 0.1, 0.2, 0.2], dtype=jnp.float32)

    # Case 1: small shapes consistent with the module (batch=2, seq=8).
    B, N = 2, 8
    xy = jax.random.uniform(k1, (B, N, 2), jnp.float32, 0.0, 16.0)
    wh = jax.random.uniform(k2, (B, N, 2), jnp.float32, 1.0, 8.0)
    boxes = jnp.concatenate([xy, xy + wh], axis=2)           # (2, 8, 4)
    deltas = jax.random.normal(k3, (B, N, 4), jnp.float32)   # (2, 8, 4)

    pred = jax.block_until_ready(bbox_transform(boxes, deltas, mean, std))
    ref = _reference(boxes, deltas, mean, std)
    assert pred.shape == (B, N, 4)
    assert jnp.allclose(pred, ref, atol=1e-5, rtol=1e-5), "case1 mismatch"

    # Case 2: larger N with a small tile to exercise the multi-step parallel
    # grid, the ragged (partial) last block and the tiny tail pad.
    B2, N2 = 2, 1500
    xy2 = jax.random.uniform(k4, (B2, N2, 2), jnp.float32, 0.0, 64.0)
    wh2 = jax.random.uniform(k5, (B2, N2, 2), jnp.float32, 1.0, 16.0)
    boxes2 = jnp.concatenate([xy2, xy2 + wh2], axis=2)
    deltas2 = jax.random.normal(k6, (B2, N2, 4), jnp.float32)

    pred2 = jax.block_until_ready(
        bbox_transform(boxes2, deltas2, mean, std, tm=64))
    ref2 = _reference(boxes2, deltas2, mean, std)
    assert pred2.shape == (B2, N2, 4)
    assert jnp.allclose(pred2, ref2, atol=1e-5, rtol=1e-5), "case2 mismatch"

    print("KERNEL_OK")
</pallas_src>

<mosaic_0001>
module attributes {stable_mosaic.version = 11 : i64} {
  func.func @_bbox_kernel(%arg0: i32, %arg1: memref<1x128xf32, #tpu.memory_space<vmem>>, %arg2: memref<1x128xf32, #tpu.memory_space<vmem>>, %arg3: memref<8x128xf32, #tpu.memory_space<vmem>>, %arg4: memref<8x128xf32, #tpu.memory_space<vmem>>, %arg5: memref<8x128xf32, #tpu.memory_space<vmem>>) attributes {dimension_semantics = [#tpu.dimension_semantics<parallel>], iteration_bounds = array<i64: 1>, scalar_prefetch = 0 : i64, scratch_operands = 0 : i64, tpu.core_type = #tpu.core_type<tc>, window_params = [{pipeline_mode = #tpu.pipeline_mode<synchronous>, transform_indices = @transform_0, window_bounds = array<i64: 1, 128>}, {pipeline_mode = #tpu.pipeline_mode<synchronous>, transform_indices = @transform_1, window_bounds = array<i64: 1, 128>}, {transform_indices = @transform_2, window_bounds = array<i64: 8, 128>}, {transform_indices = @transform_3, window_bounds = array<i64: 8, 128>}, {transform_indices = @transform_4, window_bounds = array<i64: 8, 128>}]} {
    %c0 = arith.constant 0 : index
    %c0_0 = arith.constant 0 : index
    %0 = vector.load %arg3[%c0, %c0_0] : memref<8x128xf32, #tpu.memory_space<vmem>>, vector<8x128xf32>
    %c0_1 = arith.constant 0 : index
    %c0_2 = arith.constant 0 : index
    %1 = vector.load %arg4[%c0_1, %c0_2] : memref<8x128xf32, #tpu.memory_space<vmem>>, vector<8x128xf32>
    %2 = tpu.iota {dimensions = array<i32: 1>} : vector<8x128xi32>
    %c3_i32 = arith.constant 3 : i32
    %3 = vector.broadcast %c3_i32 : i32 to vector<8x128xi32>
    %4 = arith.andi %2, %3 : vector<8x128xi32>
    %c2_i32 = arith.constant 2 : i32
    %5 = vector.broadcast %c2_i32 : i32 to vector<8x128xi32>
    %6 = arith.cmpi slt, %4, %5 : vector<8x128xi32>
    %c2_i32_3 = arith.constant 2 : i32
    %7 = tpu.dynamic_rotate %0 by %c2_i32_3 dim 1 : vector<8x128xf32>, i32 -> vector<8x128xf32>
    %c126_i32 = arith.constant 126 : i32
    %8 = tpu.dynamic_rotate %0 by %c126_i32 dim 1 : vector<8x128xf32>, i32 -> vector<8x128xf32>
    %9 = arith.select %6, %0, %7 : vector<8x128xi1>, vector<8x128xf32>
    %10 = arith.select %6, %8, %0 : vector<8x128xi1>, vector<8x128xf32>
    %11 = arith.subf %10, %9 : vector<8x128xf32>
    %cst = arith.constant 5.000000e-01 : f32
    %12 = vector.broadcast %cst : f32 to vector<8x128xf32>
    %13 = arith.mulf %12, %11 : vector<8x128xf32>
    %14 = arith.addf %9, %13 : vector<8x128xf32>
    %c0_4 = arith.constant 0 : index
    %c0_5 = arith.constant 0 : index
    %15 = vector.load %arg1[%c0_4, %c0_5] : memref<1x128xf32, #tpu.memory_space<vmem>>, vector<1x128xf32>
    %16 = vector.broadcast %15 : vector<1x128xf32> to vector<8x128xf32>
    %17 = arith.mulf %1, %16 : vector<8x128xf32>
    %c0_6 = arith.constant 0 : index
    %c0_7 = arith.constant 0 : index
    %18 = vector.load %arg2[%c0_6, %c0_7] : memref<1x128xf32, #tpu.memory_space<vmem>>, vector<1x128xf32>
    %19 = vector.broadcast %18 : vector<1x128xf32> to vector<8x128xf32>
    %20 = arith.addf %17, %19 : vector<8x128xf32>
    %c2_i32_8 = arith.constant 2 : i32
    %21 = tpu.dynamic_rotate %20 by %c2_i32_8 dim 1 : vector<8x128xf32>, i32 -> vector<8x128xf32>
    %c126_i32_9 = arith.constant 126 : i32
    %22 = tpu.dynamic_rotate %20 by %c126_i32_9 dim 1 : vector<8x128xf32>, i32 -> vector<8x128xf32>
    %23 = arith.select %6, %20, %21 : vector<8x128xi1>, vector<8x128xf32>
    %24 = arith.select %6, %22, %20 : vector<8x128xi1>, vector<8x128xf32>
    %25 = arith.mulf %23, %11 : vector<8x128xf32>
    %26 = arith.addf %14, %25 : vector<8x128xf32>
    %27 = math.exp %24 : vector<8x128xf32>
    %28 = arith.mulf %27, %11 : vector<8x128xf32>
    %cst_10 = arith.constant 5.000000e-01 : f32
    %29 = vector.broadcast %cst_10 : f32 to vector<8x128xf32>
    %30 = arith.mulf %29, %28 : vector<8x128xf32>
    %31 = arith.subf %26, %30 : vector<8x128xf32>
    %32 = arith.addf %26, %30 : vector<8x128xf32>
    %33 = arith.select %6, %31, %32 : vector<8x128xi1>, vector<8x128xf32>
    %c0_11 = arith.constant 0 : index
    %c0_12 = arith.constant 0 : index
    %34 = vector.load %arg5[%c0_11, %c0_12] : memref<8x128xf32, #tpu.memory_space<vmem>>, vector<8x128xf32>
    tpu.vector_store %arg5[%c0_11, %c0_12], %33 {strides = array<i32>} : memref<8x128xf32, #tpu.memory_space<vmem>>, vector<8x128xf32>,
    return
  }
  func.func @transform_0(%arg0: i32) -> (i32, i32) {
    %c0_i32 = arith.constant 0 : i32
    %c0_i32_0 = arith.constant 0 : i32
    %c0_i32_1 = arith.constant 0 : i32
    return %c0_i32, %c0_i32_0 : i32, i32
  }
  func.func @transform_1(%arg0: i32) -> (i32, i32) {
    %c0_i32 = arith.constant 0 : i32
    %c0_i32_0 = arith.constant 0 : i32
    %c0_i32_1 = arith.constant 0 : i32
    return %c0_i32, %c0_i32_0 : i32, i32
  }
  func.func @transform_2(%arg0: i32) -> (i32, i32) {
    %c0_i32 = arith.constant 0 : i32
    %c0_i32_0 = arith.constant 0 : i32
    return %arg0, %c0_i32 : i32, i32
  }
  func.func @transform_3(%arg0: i32) -> (i32, i32) {
    %c0_i32 = arith.constant 0 : i32
    %c0_i32_0 = arith.constant 0 : i32
    return %arg0, %c0_i32 : i32, i32
  }
  func.func @transform_4(%arg0: i32) -> (i32, i32) {
    %c0_i32 = arith.constant 0 : i32
    %c0_i32_0 = arith.constant 0 : i32
    return %arg0, %c0_i32 : i32, i32
  }
}

</mosaic_0001>

<bundles_post_ra>
// kernel: tpu_custom_call.1
= control target key start
LH: loop header
LB: loop body
LE: loop exit
PB: predicated region body
PF: predicated region fallthrough
CT: control target
= control target key end

     0   :  { %9 = vsyncpa [#allocation3], 0  ;;  %s272_s0 = inlined_call_operand.hbm [shape: f32[1,128], index: 0, kind: input, shape index: {}]   ;;  %s273_s1 = inlined_call_operand.vmem [shape: f32[1,128], index: 1, kind: input, shape index: {}]   ;;  %s274_s2 = inlined_call_operand.hbm [shape: f32[8,128], index: 2, kind: input, shape index: {}]   ;;  %s275_s3 = inlined_call_operand.vmem [shape: f32[8,128], index: 3, kind: input, shape index: {}]   ;;  %s276_s4 = inlined_call_operand.hbm [shape: f32[8,128], index: 4, kind: output, shape index: {}]  }
   0x1   :  { %10 = vsyncpa [#allocation6], 0 }
   0x2   :  { %11 = vsyncpa [#allocation4], 0  ;;  %s186_s15 = smov [#allocation2]   ;;  %s187_s17 = smov [#allocation5]  }
   0x3   :  { %s18_s16 = sshll.u32 %s186_s15, 4  ;;  %s30_s18 = sshll.u32 %s187_s17, 4  ;;  %s19_s16 = int_to_ptr.vmem [resolvable:$true] %s18_s16  ;;  %s31_s18 = int_to_ptr.vmem [resolvable:$true] %s30_s18 }
   0x4   :  { %s114_s21 = scalar_lea.hbm %s272_s0, 16 }
   0x5   :  { %p115_p0 = scmp.ne.s32.totalorder %s272_s0, %s114_s21  ;;  %p118_p1 = scmp.lt.u32.totalorder %s114_s21, %s272_s0 }
   0x7   :  { %p120_p2 = pnand %p118_p1, %p115_p0 }
   0x9   :  { %123 = shalt.err (!%p120_p2)
}
   0xa   :  { %s124_s26 = scalar_lea.vmem %s19_s16, 16  ;;  %s128_s27 = scalar_lea.vmem %s19_s16, 32 }
   0xb   :  { %p125_p3 = scmp.ne.s32.totalorder %s19_s16, %s124_s26  ;;  %p129_p4 = scmp.lt.s32.totalorder %s19_s16, %s19_s16 }
   0xc   :  { %p130_p5 = scmp.lt.s32.totalorder %s128_s27, %s124_s26 }
   0xe   :  { %p131_p6 = por %p130_p5, %p129_p4 }
  0x10   :  { %p132_p7 = pnand %p131_p6, %p125_p3 }
  0x12   :  { %135 = shalt.err (!%p132_p7)
}
  0x13   :  { %21 = dma.hbm_to_vmem [thread:$0]  %s272_s0, 16, %s19_s16, [#allocation3]  }
  0x14   :  { %s136_s6 = scalar_lea.hbm %s274_s2, 128 }
  0x15   :  { %p137_p8 = scmp.ne.s32.totalorder %s274_s2, %s136_s6  ;;  %p140_p9 = scmp.lt.u32.totalorder %s136_s6, %s274_s2 }
  0x17   :  { %p142_p10 = pnand %p140_p9, %p137_p8 }
  0x19   :  { %145 = shalt.err (!%p142_p10)
}
  0x1a   :  { %s146_s11 = scalar_lea.vmem %s31_s18, 128  ;;  %p151_p12 = scmp.lt.s32.totalorder %s31_s18, %s31_s18 }
  0x1b   :  { %p147_p11 = scmp.ne.s32.totalorder %s31_s18, %s146_s11  ;;  %p152_p13 = scmp.lt.s32.totalorder %s146_s11, %s146_s11 }
  0x1d   :  { %p153_p0 = por %p152_p13, %p151_p12 }
  0x1f   :  { %p154_p1 = pnand %p153_p0, %p147_p11 }
  0x21   :  { %157 = shalt.err (!%p154_p1)
}
  0x22   :  { %33 = dma.hbm_to_vmem [thread:$0]  %s274_s2, 128, %s31_s18, [#allocation6]  }
  0x23   :  { %180 = dma.done.wait [#allocation3], 16  }
  0x24   :  { %181 = vsyncadd [#allocation3], 4294967280 }
  0x25   :  { %182 = dma.done.wait [#allocation6], 128  }
  0x26   :  { %183 = vsyncadd [#allocation6], 4294967168  ;;  %v43_v0 = vld [vmem:[%s275_s3] sm:$0xff]  ;;  %v105_v1 = vld [vmem:[#allocation2] ss:$0 sm:$0xff]  ;;  %s188_s17 = smov 126   ;;  %v44_v6 = vlaneseq }
  0x27   :  { %v106_v2 = vld [vmem:[%s273_s1] ss:$0 sm:$0xff]  ;;  %v64_v3 = vmul.f32 %v105_v1, %v43_v0  ;;  %v42_v4 = vld [vmem:[#allocation5] sm:$0xff]  ;;  %s189_s2 = smov 2   ;;  %s190_s1 = smov [#allocation7]  }
  0x28   :  { %50 = vrot.lane.b32.xlu1 %v42_v4, %s188_s17  ;;  %v45_v7 = vand.u32 127, %v44_v6  ;;  %s95_s3 = sshll.u32 %s190_s1, 4  ;;  %s96_s3 = int_to_ptr.vmem [resolvable:$true] %s95_s3 }
  0x29   :  { %v72_v5 = vadd.f32 %v106_v2, %v64_v3  ;;  %s158_s18 = scalar_lea.vmem %s96_s3, 128  ;;  %p163_p3 = scmp.lt.s32.totalorder %s96_s3, %s96_s3 }
  0x2a   :  { %v46_v8 = vand.u32 3, %v45_v7  ;;  %p159_p2 = scmp.ne.s32.totalorder %s96_s3, %s158_s18  ;;  %p164_p4 = scmp.lt.s32.totalorder %s158_s18, %s158_s18 }
  0x2b   :  { %75 = vrot.lane.b32.xlu0 %v72_v5, %s188_s17 }
  0x2c   :  { %73 = vrot.lane.b32.xlu1 %v72_v5, %s189_s2  ;;  %vm246_vm0 = vcmp.lt.s32.totalorder %v46_v8, 2  ;;  %p165_p5 = por %p164_p4, %p163_p3 }
  0x2e   :  { %p166_p6 = pnand %p165_p5, %p159_p2 }
  0x2f   :  { %48 = vrot.lane.b32.xlu0 %v42_v4, %s189_s2 }
  0x9a   :  { %v51_v11 = vpop.permute.xlu1 %50 }
  0x9b   :  { %v53_v14 = vsel %vm246_vm0, %v51_v11, %v42_v4 }
  0x9d   :  { %v76_v10 = vpop.permute.xlu0 %75 }
  0x9e   :  { %v78_v12 = vsel %vm246_vm0, %v76_v10, %v72_v5  ;;  %v74_v18 = vpop.permute.xlu1 %73 }
  0x9f   :  { %v81_v13 = vmul.f32 1.442695, %v78_v12  ;;  %v77_v20 = vsel %vm246_vm0, %v72_v5, %v74_v18 }
  0xa1   :  { %112 = vpow2.f32 %v81_v13  ;;  %v49_v15 = vpop.permute.xlu0 %48 }
  0xa2   :  { %v52_v16 = vsel %vm246_vm0, %v42_v4, %v49_v15 }
  0xa3   :  { %v54_v17 = vsub.f32 %v53_v14, %v52_v16 }
  0xa5   :  { %v55_v19 = vmul.f32 0.5, %v54_v17  ;;  %v79_v22 = vmul.f32 %v77_v20, %v54_v17 }
  0xa7   :  { %v56_v21 = vadd.f32 %v55_v19, %v52_v16 }
  0xa9   :  { %v80_v26 = vadd.f32 %v79_v22, %v56_v21 }
  0xab   :  { %v113_v23 = vpop.eup %112 }
  0xac   :  { %v83_v24 = vmul.f32 %v113_v23, %v54_v17 }
  0xae   :  { %v84_v25 = vmul.f32 0.5, %v83_v24 }
  0xb0   :  { %v85_v27 = vsub.f32 %v80_v26, %v84_v25  ;;  %v86_v28 = vadd.f32 %v84_v25, %v80_v26 }
  0xb2   :  { %v87_v29 = vsel %vm246_vm0, %v85_v27, %v86_v28 }
  0xb3   :  { %88 = vst [vmem:[#allocation7] sm:$0xff] %v87_v29 }
  0xb4   :  { %169 = shalt.err (!%p166_p6)
}
  0xb5   :  { %s170_s21 = scalar_lea.hbm %s276_s4, 128 }
  0xb6   :  { %p171_p7 = scmp.ne.s32.totalorder %s276_s4, %s170_s21  ;;  %p174_p8 = scmp.lt.u32.totalorder %s170_s21, %s276_s4 }
  0xb8   :  { %p176_p9 = pnand %p174_p8, %p171_p7 }
  0xba   :  { %179 = shalt.err (!%p176_p9)
}
  0xbb   :  { %98 = dma.vmem_to_hbm [thread:$0]  %s96_s3, 128, %s276_s4, [#allocation4]  }
  0xbc   :  { %184 = dma.done.wait [#allocation4], 128  }
  0xbd   :  { %185 = vsyncadd [#allocation4], 4294967168 }
  0xbe   :  { %102 = vsyncpa [#allocation3], 1 }
  0xbf   :  { %103 = vsyncpa [#allocation6], 1 }
  0xc0   :  { %104 = vsyncpa [#allocation4], 1 }

</bundles_post_ra>
